<compile_context>
chip_gen: v7x
topology: tpu7x:2x2x1
jax: 0.10.0
libtpu: 0.0.40
codegen_flags: <defaults>
</compile_context>

<pallas_src>
import functools

import jax
import jax.numpy as jnp
from jax.experimental import pallas as pl
from jax.experimental.pallas import tpu as pltpu


_SMOOTH = 1.0
# Budget for the streamed inputs: 2 inputs x 2 pipeline buffers of one block
# must stay under this.  Well below v5e's 16 MiB default scoped-VMEM limit.
_INPUT_VMEM_BUDGET = 10 * 1024 * 1024


def _round_down(v, m):
    return (v // m) * m


def _dice_partial_3d_kernel(x_ref, t_ref, inter_ref, xsum_ref, tsum_ref, *,
                            s_total, ts):
    """Blocks are (tn, ts, 128); accumulates (tn, 128) lane-wide partials."""
    k = pl.program_id(1)

    @pl.when(k == 0)
    def _():
        inter_ref[...] = jnp.zeros_like(inter_ref)
        xsum_ref[...] = jnp.zeros_like(xsum_ref)
        tsum_ref[...] = jnp.zeros_like(tsum_ref)

    x = x_ref[...].astype(jnp.float32)
    t = t_ref[...].astype(jnp.float32)

    if s_total % ts:  # static: ragged tail on the folded reduction dim
        row = jax.lax.broadcasted_iota(jnp.int32, x.shape, 1) + k * ts
        keep = row < s_total
        x = jnp.where(keep, x, 0.0)
        t = jnp.where(keep, t, 0.0)

    inter_ref[...] += jnp.sum(x * t, axis=1)
    xsum_ref[...] += jnp.sum(x, axis=1)
    tsum_ref[...] += jnp.sum(t, axis=1)


def _dice_partial_2d_kernel(x_ref, t_ref, inter_ref, xsum_ref, tsum_ref, *,
                            d_total, td):
    """Blocks are (tn, td); accumulates (tn, 1) partial sums."""
    k = pl.program_id(1)

    @pl.when(k == 0)
    def _():
        inter_ref[...] = jnp.zeros_like(inter_ref)
        xsum_ref[...] = jnp.zeros_like(xsum_ref)
        tsum_ref[...] = jnp.zeros_like(tsum_ref)

    x = x_ref[...].astype(jnp.float32)
    t = t_ref[...].astype(jnp.float32)

    if d_total % td:  # static: ragged tail on the lane axis
        col = jax.lax.broadcasted_iota(jnp.int32, x.shape, 1) + k * td
        keep = col < d_total
        x = jnp.where(keep, x, 0.0)
        t = jnp.where(keep, t, 0.0)

    inter_ref[...] += jnp.sum(x * t, axis=1, keepdims=True)
    xsum_ref[...] += jnp.sum(x, axis=1, keepdims=True)
    tsum_ref[...] += jnp.sum(t, axis=1, keepdims=True)


def _per_sample_sums(x, t):
    """x, t: (N, D) in native dtype. Returns (inter, sum_x, sum_t), each (N,) f32."""
    n, d = x.shape

    # Batch blocking: blocks of 8 fill the sublane dim and give the "parallel"
    # axis something to shard across TensorCores; otherwise take the full
    # batch in one block (keeps BlockSpecs legal for any N).
    tn = 8 if n % 8 == 0 else n
    num_b = n // tn

    isz = jnp.dtype(x.dtype).itemsize + jnp.dtype(t.dtype).itemsize
    # Elements per input block so that 2 inputs x 2 buffers fit the budget.
    block_elems = max(1, _INPUT_VMEM_BUDGET // (2 * isz))

    if d % 128 == 0:
        # Fold D -> (S, 128): fills sublanes even when N is tiny, and lets the
        # per-tile reduction keep lane-wide (tn, 128) partials.
        s = d // 128
        ts_blk = max(8, _round_down(block_elems // (tn * 128), 8))
        if ts_blk >= s:
            ts_blk = s
        grid_r = pl.cdiv(s, ts_blk)
        x_in = x.reshape(n, s, 128)   # free reshape, no HBM pass
        t_in = t.reshape(n, s, 128)
        kernel = functools.partial(_dice_partial_3d_kernel, s_total=s, ts=ts_blk)
        in_spec = pl.BlockSpec((tn, ts_blk, 128), lambda i, k: (i, k, 0))
        out_spec = pl.BlockSpec((tn, 128), lambda i, k: (i, 0))
        out_shape = [jax.ShapeDtypeStruct((n, 128), jnp.float32)] * 3
    else:
        # General D: 2-D blocks with an in-kernel lane mask on the tail.
        tn_pad = -(-tn // 8) * 8  # VMEM tiles pad the sublane dim to 8
        td = max(128, _round_down(block_elems // tn_pad, 128))
        if td >= d:
            td = d
        grid_r = pl.cdiv(d, td)
        x_in, t_in = x, t
        kernel = functools.partial(_dice_partial_2d_kernel, d_total=d, td=td)
        in_spec = pl.BlockSpec((tn, td), lambda i, k: (i, k))
        out_spec = pl.BlockSpec((tn, 1), lambda i, k: (i, 0))
        out_shape = [jax.ShapeDtypeStruct((n, 1), jnp.float32)] * 3

    inter, xsum, tsum = pl.pallas_call(
        kernel,
        out_shape=out_shape,
        grid_spec=pltpu.PrefetchScalarGridSpec(
            num_scalar_prefetch=0,
            grid=(num_b, grid_r),
            in_specs=[in_spec, in_spec],
            out_specs=[out_spec, out_spec, out_spec],
        ),
        compiler_params=pltpu.CompilerParams(
            dimension_semantics=("parallel", "arbitrary")),
    )(x_in, t_in)

    return (jnp.sum(inter, axis=-1),
            jnp.sum(xsum, axis=-1),
            jnp.sum(tsum, axis=-1))


def dice_loss(input_, target):
    """Pallas implementation of DiceLoss.forward; returns a scalar float32."""
    n = target.shape[0]
    x = jnp.reshape(input_, (n, -1))   # native dtype: no extra HBM cast pass
    t = jnp.reshape(target, (n, -1))
    inter, xsum, tsum = _per_sample_sums(x, t)
    # smooth is added AFTER the (masked) sums, matching the reference.
    dice = 2.0 * (inter + _SMOOTH) / (xsum + tsum + _SMOOTH)
    loss = 1.0 - jnp.sum(dice) / jnp.float32(n)
    return loss.astype(jnp.float32)


def _dice_loss_ref(input_, target):
    n = target.shape[0]
    xf = jnp.reshape(input_, (n, -1)).astype(jnp.float32)
    tf = jnp.reshape(target, (n, -1)).astype(jnp.float32)
    inter = jnp.sum(xf * tf, axis=1)
    loss = 2.0 * (inter + _SMOOTH) / (
        jnp.sum(xf, axis=1) + jnp.sum(tf, axis=1) + _SMOOTH)
    return 1.0 - jnp.sum(loss) / n


if __name__ == "__main__":
    key = jax.random.PRNGKey(0)
    k1, k2 = jax.random.split(key)
    # Small NCHW shapes: batch=2, channels=4, spatial=16x16.
    x = jax.random.uniform(k1, (2, 4, 16, 16), dtype=jnp.float32)
    y = (jax.random.uniform(k2, (2, 4, 16, 16)) > 0.5).astype(jnp.float32)

    out = dice_loss(x, y)
    jax.block_until_ready(out)

    ref = _dice_loss_ref(x, y)
    assert jnp.allclose(out, ref, rtol=1e-5, atol=1e-5), (out, ref)
    print("KERNEL_OK")
</pallas_src>

<mosaic_0001>
module attributes {stable_mosaic.version = 11 : i64} {
  func.func @_dice_partial_3d_kernel(%arg0: i32, %arg1: i32, %arg2: memref<2x8x128xf32, #tpu.memory_space<vmem>>, %arg3: memref<2x8x128xf32, #tpu.memory_space<vmem>>, %arg4: memref<2x128xf32, #tpu.memory_space<vmem>>, %arg5: memref<2x128xf32, #tpu.memory_space<vmem>>, %arg6: memref<2x128xf32, #tpu.memory_space<vmem>>) attributes {dimension_semantics = [#tpu.dimension_semantics<parallel>, #tpu.dimension_semantics<arbitrary>], iteration_bounds = array<i64: 1, 1>, scalar_prefetch = 0 : i64, scratch_operands = 0 : i64, tpu.core_type = #tpu.core_type<tc>, window_params = [{transform_indices = @transform_0, window_bounds = array<i64: 2, 8, 128>}, {transform_indices = @transform_1, window_bounds = array<i64: 2, 8, 128>}, {transform_indices = @transform_2, window_bounds = array<i64: 2, 128>}, {transform_indices = @transform_3, window_bounds = array<i64: 2, 128>}, {transform_indices = @transform_4, window_bounds = array<i64: 2, 128>}]} {
    %c0_i32 = arith.constant 0 : i32
    %0 = arith.cmpi eq, %arg1, %c0_i32 : i32
    %1 = arith.extui %0 : i1 to i32
    %c0_i32_0 = arith.constant 0 : i32
    %2 = arith.cmpi ne, %1, %c0_i32_0 : i32
    scf.if %2 {
      %cst_20 = arith.constant 0.000000e+00 : f32
      %18 = vector.broadcast %cst_20 : f32 to vector<2x128xf32>
      %c0_21 = arith.constant 0 : index
      %c0_22 = arith.constant 0 : index
      %19 = vector.load %arg4[%c0_21, %c0_22] : memref<2x128xf32, #tpu.memory_space<vmem>>, vector<2x128xf32>
      tpu.vector_store %arg4[%c0_21, %c0_22], %18 {strides = array<i32>} : memref<2x128xf32, #tpu.memory_space<vmem>>, vector<2x128xf32>,
      %cst_23 = arith.constant 0.000000e+00 : f32
      %20 = vector.broadcast %cst_23 : f32 to vector<2x128xf32>
      %c0_24 = arith.constant 0 : index
      %c0_25 = arith.constant 0 : index
      %21 = vector.load %arg5[%c0_24, %c0_25] : memref<2x128xf32, #tpu.memory_space<vmem>>, vector<2x128xf32>
      tpu.vector_store %arg5[%c0_24, %c0_25], %20 {strides = array<i32>} : memref<2x128xf32, #tpu.memory_space<vmem>>, vector<2x128xf32>,
      %cst_26 = arith.constant 0.000000e+00 : f32
      %22 = vector.broadcast %cst_26 : f32 to vector<2x128xf32>
      %c0_27 = arith.constant 0 : index
      %c0_28 = arith.constant 0 : index
      %23 = vector.load %arg6[%c0_27, %c0_28] : memref<2x128xf32, #tpu.memory_space<vmem>>, vector<2x128xf32>
      tpu.vector_store %arg6[%c0_27, %c0_28], %22 {strides = array<i32>} : memref<2x128xf32, #tpu.memory_space<vmem>>, vector<2x128xf32>,
    } else {
    }
    %c0 = arith.constant 0 : index
    %c0_1 = arith.constant 0 : index
    %c0_2 = arith.constant 0 : index
    %3 = vector.load %arg2[%c0, %c0_1, %c0_2] : memref<2x8x128xf32, #tpu.memory_space<vmem>>, vector<2x8x128xf32>
    %c0_3 = arith.constant 0 : index
    %c0_4 = arith.constant 0 : index
    %c0_5 = arith.constant 0 : index
    %4 = vector.load %arg3[%c0_3, %c0_4, %c0_5] : memref<2x8x128xf32, #tpu.memory_space<vmem>>, vector<2x8x128xf32>
    %c0_6 = arith.constant 0 : index
    %c0_7 = arith.constant 0 : index
    %5 = vector.load %arg4[%c0_6, %c0_7] : memref<2x128xf32, #tpu.memory_space<vmem>>, vector<2x128xf32>
    %6 = arith.mulf %3, %4 : vector<2x8x128xf32>
    %cst = arith.constant dense<0.000000e+00> : vector<2x128xf32>
    %7 = vector.multi_reduction <add>, %6, %cst [1] : vector<2x8x128xf32> to vector<2x128xf32>
    %8 = arith.addf %5, %7 : vector<2x128xf32>
    %c0_8 = arith.constant 0 : index
    %c0_9 = arith.constant 0 : index
    %9 = vector.load %arg4[%c0_8, %c0_9] : memref<2x128xf32, #tpu.memory_space<vmem>>, vector<2x128xf32>
    tpu.vector_store %arg4[%c0_8, %c0_9], %8 {strides = array<i32>} : memref<2x128xf32, #tpu.memory_space<vmem>>, vector<2x128xf32>,
    %c0_10 = arith.constant 0 : index
    %c0_11 = arith.constant 0 : index
    %10 = vector.load %arg5[%c0_10, %c0_11] : memref<2x128xf32, #tpu.memory_space<vmem>>, vector<2x128xf32>
    %cst_12 = arith.constant dense<0.000000e+00> : vector<2x128xf32>
    %11 = vector.multi_reduction <add>, %3, %cst_12 [1] : vector<2x8x128xf32> to vector<2x128xf32>
    %12 = arith.addf %10, %11 : vector<2x128xf32>
    %c0_13 = arith.constant 0 : index
    %c0_14 = arith.constant 0 : index
    %13 = vector.load %arg5[%c0_13, %c0_14] : memref<2x128xf32, #tpu.memory_space<vmem>>, vector<2x128xf32>
    tpu.vector_store %arg5[%c0_13, %c0_14], %12 {strides = array<i32>} : memref<2x128xf32, #tpu.memory_space<vmem>>, vector<2x128xf32>,
    %c0_15 = arith.constant 0 : index
    %c0_16 = arith.constant 0 : index
    %14 = vector.load %arg6[%c0_15, %c0_16] : memref<2x128xf32, #tpu.memory_space<vmem>>, vector<2x128xf32>
    %cst_17 = arith.constant dense<0.000000e+00> : vector<2x128xf32>
    %15 = vector.multi_reduction <add>, %4, %cst_17 [1] : vector<2x8x128xf32> to vector<2x128xf32>
    %16 = arith.addf %14, %15 : vector<2x128xf32>
    %c0_18 = arith.constant 0 : index
    %c0_19 = arith.constant 0 : index
    %17 = vector.load %arg6[%c0_18, %c0_19] : memref<2x128xf32, #tpu.memory_space<vmem>>, vector<2x128xf32>
    tpu.vector_store %arg6[%c0_18, %c0_19], %16 {strides = array<i32>} : memref<2x128xf32, #tpu.memory_space<vmem>>, vector<2x128xf32>,
    return
  }
  func.func @transform_0(%arg0: i32, %arg1: i32) -> (i32, i32, i32) {
    %c0_i32 = arith.constant 0 : i32
    %c0_i32_0 = arith.constant 0 : i32
    return %arg0, %arg1, %c0_i32 : i32, i32, i32
  }
  func.func @transform_1(%arg0: i32, %arg1: i32) -> (i32, i32, i32) {
    %c0_i32 = arith.constant 0 : i32
    %c0_i32_0 = arith.constant 0 : i32
    return %arg0, %arg1, %c0_i32 : i32, i32, i32
  }
  func.func @transform_2(%arg0: i32, %arg1: i32) -> (i32, i32) {
    %c0_i32 = arith.constant 0 : i32
    %c0_i32_0 = arith.constant 0 : i32
    return %arg0, %c0_i32 : i32, i32
  }
  func.func @transform_3(%arg0: i32, %arg1: i32) -> (i32, i32) {
    %c0_i32 = arith.constant 0 : i32
    %c0_i32_0 = arith.constant 0 : i32
    return %arg0, %c0_i32 : i32, i32
  }
  func.func @transform_4(%arg0: i32, %arg1: i32) -> (i32, i32) {
    %c0_i32 = arith.constant 0 : i32
    %c0_i32_0 = arith.constant 0 : i32
    return %arg0, %c0_i32 : i32, i32
  }
}

</mosaic_0001>

<bundles_post_ra>
// kernel: tpu_custom_call.1
= control target key start
LH: loop header
LB: loop body
LE: loop exit
PB: predicated region body
PF: predicated region fallthrough
CT: control target
= control target key end

     0   :  { %10 = vsyncpa [#allocation3], 0  ;;  %s394_s0 = inlined_call_operand.hbm [shape: f32[2,8,128], index: 0, kind: input, shape index: {}]   ;;  %s395_s1 = inlined_call_operand.hbm [shape: f32[2,8,128], index: 1, kind: input, shape index: {}]   ;;  %s396_s2 = inlined_call_operand.hbm [shape: f32[2,128], index: 2, kind: output, shape index: {0}]   ;;  %s397_s3 = inlined_call_operand.hbm [shape: f32[2,128], index: 3, kind: output, shape index: {1}]   ;;  %s398_s4 = inlined_call_operand.hbm [shape: f32[2,128], index: 4, kind: output, shape index: {2}]  }
   0x1   :  { %11 = vsyncpa [#allocation6], 0 }
   0x2   :  { %12 = vsyncpa [#allocation4], 0 }
   0x3   :  { %13 = vsyncpa [#allocation9], 0  ;;  %s284_s15 = smov [#allocation2]   ;;  %s166_s19 = scalar_lea.hbm %s394_s0, 256 }
   0x4   :  { %s19_s16 = sshll.u32 %s284_s15, 4  ;;  %p167_p0 = scmp.ne.s32.totalorder %s394_s0, %s166_s19  ;;  %s20_s16 = int_to_ptr.vmem [resolvable:$true] %s19_s16 }
   0x5   :  { %p170_p1 = scmp.lt.u32.totalorder %s166_s19, %s394_s0 }
   0x7   :  { %p172_p2 = pnand %p170_p1, %p167_p0 }
   0x9   :  { %175 = shalt.err (!%p172_p2)
}
   0xa   :  { %s176_s24 = scalar_lea.vmem %s20_s16, 256  ;;  %p181_p4 = scmp.lt.s32.totalorder %s20_s16, %s20_s16 }
   0xb   :  { %p177_p3 = scmp.ne.s32.totalorder %s20_s16, %s176_s24  ;;  %p182_p5 = scmp.lt.s32.totalorder %s176_s24, %s176_s24 }
   0xd   :  { %p183_p6 = por %p182_p5, %p181_p4 }
   0xf   :  { %p184_p7 = pnand %p183_p6, %p177_p3 }
  0x11   :  { %187 = shalt.err (!%p184_p7)
}
  0x12   :  { %s285_s25 = smov 128   ;;  %s286_s26 = smov 8  }
  0x13   :  { %25 = dma.hbm_to_vmem [thread:$0]  %s394_s0, 256, %s20_s16, [#allocation3], %s285_s25, %s285_s25, %s286_s26  }
  0x14   :  { %s287_s29 = smov [#allocation5]   ;;  %s188_s7 = scalar_lea.hbm %s395_s1, 256 }
  0x15   :  { %s31_s30 = sshll.u32 %s287_s29, 4  ;;  %p189_p8 = scmp.ne.s32.totalorder %s395_s1, %s188_s7  ;;  %s32_s30 = int_to_ptr.vmem [resolvable:$true] %s31_s30 }
  0x16   :  { %p192_p9 = scmp.lt.u32.totalorder %s188_s7, %s395_s1 }
  0x18   :  { %p194_p10 = pnand %p192_p9, %p189_p8 }
  0x1a   :  { %197 = shalt.err (!%p194_p10)
}
  0x1b   :  { %s198_s12 = scalar_lea.vmem %s32_s30, 256  ;;  %p203_p12 = scmp.lt.s32.totalorder %s32_s30, %s32_s30 }
  0x1c   :  { %p199_p11 = scmp.ne.s32.totalorder %s32_s30, %s198_s12  ;;  %p204_p13 = scmp.lt.s32.totalorder %s198_s12, %s198_s12 }
  0x1e   :  { %p205_p0 = por %p204_p13, %p203_p12 }
  0x20   :  { %p206_p1 = pnand %p205_p0, %p199_p11 }
  0x22   :  { %209 = shalt.err (!%p206_p1)
}
  0x23   :  { %37 = dma.hbm_to_vmem [thread:$0]  %s395_s1, 256, %s32_s30, [#allocation6], %s285_s25, %s285_s25, %s286_s26  }
  0x24   :  { %276 = dma.done.wait [#allocation3], 256  }
  0x25   :  { %277 = vsyncadd [#allocation3], 4294967040 }
  0x26   :  { %278 = dma.done.wait [#allocation6], 256  }
  0x27   :  { %279 = vsyncadd [#allocation6], 4294967040  ;;  %v288_v0 = vmov 0.0   ;;  %v51_v1 = vld [vmem:[#allocation2] sm:$0xff]  ;;  %v52_v2 = vld [vmem:[#allocation2 + $0x8] sm:$0xff]  ;;  %vm72_vm0 = vcmask 1041409  }
  0x28   :  { %49 = vst [vmem:[#allocation8] sm:$0x3] %v288_v0  ;;  %48 = vst [vmem:[#allocation7] sm:$0x3] %v288_v0  ;;  %v53_v3 = vld [vmem:[#allocation5] sm:$0xff]  ;;  %v78_v4 = vrot.slane %v51_v1, 4 }
  0x29   :  { %50 = vst [vmem:[#allocation10] sm:$0x3] %v288_v0  ;;  %v84_v5 = vrot.slane %v52_v2, 4  ;;  %v54_v6 = vld [vmem:[#allocation5 + $0x8] sm:$0xff]  ;;  %v56_v7 = vmul.f32 %v53_v3, %v51_v1  ;;  %v97_v8 = vrot.slane %v53_v3, 4  ;;  %s289_s1 = smov [#allocation8]  }
  0x2a   :  { %v57_v9 = vmul.f32 %v54_v6, %v52_v2  ;;  %v103_v10 = vrot.slane %v54_v6, 4  ;;  %v79_v11 = vadd.f32 %v78_v4, %v51_v1  ;;  %s131_s14 = sshll.u32 %s289_s1, 4  ;;  %s290_s15 = smov [#allocation10]   ;;  %s132_s14 = int_to_ptr.vmem [resolvable:$true] %s131_s14 }
  0x2b   :  { %v85_v12 = vadd.f32 %v84_v5, %v52_v2  ;;  %v58_v13 = vrot.slane %v56_v7, 4  ;;  %v98_v14 = vadd.f32 %v97_v8, %v53_v3  ;;  %s141_s16 = sshll.u32 %s290_s15, 4  ;;  %s291_s17 = smov [#allocation7]   ;;  %s343_s16 = int_to_ptr.vmem [resolvable:$true] %s141_s16 }
  0x2c   :  { %v64_v15 = vrot.slane %v57_v9, 4  ;;  %v104_v16 = vadd.f32 %v103_v10, %v54_v6  ;;  %v80_v17 = vrot.slane %v79_v11, 2  ;;  %s121_s18 = sshll.u32 %s291_s17, 4  ;;  %s210_s19 = scalar_lea.vmem %s132_s14, 32  ;;  %s346_s18 = int_to_ptr.vmem [resolvable:$true] %s121_s18 }
  0x2d   :  { %v86_v18 = vrot.slane %v85_v12, 2  ;;  %v59_v19 = vadd.f32 %v58_v13, %v56_v7  ;;  %v99_v20 = vrot.slane %v98_v14, 2  ;;  %p211_p2 = scmp.ne.s32.totalorder %s132_s14, %s210_s19  ;;  %p215_p3 = scmp.lt.s32.totalorder %s132_s14, %s132_s14 }
  0x2e   :  { %v65_v21 = vadd.f32 %v64_v15, %v57_v9  ;;  %v105_v22 = vrot.slane %v104_v16, 2  ;;  %v81_v23 = vadd.f32 %v80_v17, %v79_v11  ;;  %p216_p4 = scmp.lt.s32.totalorder %s210_s19, %s210_s19 }
  0x2f   :  { %v87_v24 = vadd.f32 %v86_v18, %v85_v12  ;;  %v60_v25 = vrot.slane %v59_v19, 2  ;;  %v100_v26 = vadd.f32 %v99_v20, %v98_v14  ;;  %v77_v35 = vld [vmem:[#allocation8] sm:$0x3]  ;;  %v55_v46 = vld [vmem:[#allocation7] sm:$0x3] }
  0x30   :  { %v66_v27 = vrot.slane %v65_v21, 2  ;;  %v106_v28 = vadd.f32 %v105_v22, %v104_v16  ;;  %v82_v29 = vrot.slane %v81_v23, 1  ;;  %v96_v41 = vld [vmem:[#allocation10] sm:$0x3]  ;;  %p217_p5 = por %p216_p4, %p215_p3 }
  0x31   :  { %v88_v30 = vrot.slane %v87_v24, 1  ;;  %v61_v31 = vadd.f32 %v60_v25, %v59_v19  ;;  %v101_v32 = vrot.slane %v100_v26, 1 }
  0x32   :  { %v67_v33 = vadd.f32 %v66_v27, %v65_v21  ;;  %v107_v34 = vrot.slane %v106_v28, 1  ;;  %v83_v36 = vadd.f32 %v82_v29, %v81_v23  ;;  %p218_p6 = pnand %p217_p5, %p211_p2 }
  0x33   :  { %v89_v37 = vadd.f32 %v88_v30, %v87_v24  ;;  %v62_v38 = vrot.slane %v61_v31, 1  ;;  %v102_v39 = vadd.f32 %v101_v32, %v100_v26 }
  0x34   :  { %v68_v40 = vrot.slane %v67_v33, 1  ;;  %v108_v42 = vadd.f32 %v107_v34, %v106_v28 }
  0x35   :  { %v92_v43 = vsel %vm72_vm0, %v89_v37, %v83_v36  ;;  %v63_v44 = vadd.f32 %v62_v38, %v61_v31 }
  0x36   :  { %v94_v45 = vadd.f32 %v92_v43, %v77_v35  ;;  %v69_v47 = vadd.f32 %v68_v40, %v67_v33  ;;  %v111_v48 = vsel %vm72_vm0, %v108_v42, %v102_v39 }
  0x37   :  { %v113_v49 = vadd.f32 %v111_v48, %v96_v41 }
  0x38   :  { %95 = vst [vmem:[#allocation8] sm:$0x3] %v94_v45  ;;  %v73_v50 = vsel %vm72_vm0, %v69_v47, %v63_v44 }
  0x39   :  { %v75_v51 = vadd.f32 %v73_v50, %v55_v46  ;;  %114 = vst [vmem:[#allocation10] sm:$0x3] %v113_v49 }
  0x3a   :  { %221 = shalt.err (!%p218_p6)
}
  0x3b   :  { %s222_s22 = scalar_lea.hbm %s397_s3, 32 }
  0x3c   :  { %p223_p7 = scmp.ne.s32.totalorder %s397_s3, %s222_s22  ;;  %p226_p8 = scmp.lt.u32.totalorder %s222_s22, %s397_s3 }
  0x3e   :  { %p228_p9 = pnand %p226_p8, %p223_p7 }
  0x40   :  { %231 = shalt.err (!%p228_p9)
}
  0x41   :  { %134 = dma.vmem_to_hbm [thread:$0]  %s132_s14, 32, %s397_s3, [#allocation9]  }
  0x42   :  { %s232_s29 = scalar_lea.vmem %s343_s16, 32  ;;  %p237_p11 = scmp.lt.s32.totalorder %s343_s16, %s343_s16 }
  0x43   :  { %p233_p10 = scmp.ne.s32.totalorder %s343_s16, %s232_s29  ;;  %p238_p12 = scmp.lt.s32.totalorder %s232_s29, %s232_s29 }
  0x45   :  { %p239_p13 = por %p238_p12, %p237_p11 }
  0x47   :  { %p240_p0 = pnand %p239_p13, %p233_p10 }
  0x49   :  { %243 = shalt.err (!%p240_p0)
}
  0x4a   :  { %s244_s6 = scalar_lea.hbm %s398_s4, 32 }
  0x4b   :  { %p245_p1 = scmp.ne.s32.totalorder %s398_s4, %s244_s6  ;;  %p248_p2 = scmp.lt.u32.totalorder %s244_s6, %s398_s4 }
  0x4d   :  { %p250_p3 = pnand %p248_p2, %p245_p1 }
  0x4f   :  { %253 = shalt.err (!%p250_p3)
}
  0x50   :  { %144 = dma.vmem_to_hbm [thread:$0]  %s343_s16, 32, %s398_s4, [#allocation9]   ;;  %76 = vst [vmem:[#allocation7] sm:$0x3] %v75_v51 }
  0x51   :  { %s254_s12 = scalar_lea.vmem %s346_s18, 32  ;;  %p259_p5 = scmp.lt.s32.totalorder %s346_s18, %s346_s18 }
  0x52   :  { %p255_p4 = scmp.ne.s32.totalorder %s346_s18, %s254_s12  ;;  %p260_p6 = scmp.lt.s32.totalorder %s254_s12, %s254_s12 }
  0x54   :  { %p261_p7 = por %p260_p6, %p259_p5 }
  0x56   :  { %p262_p8 = pnand %p261_p7, %p255_p4 }
  0x58   :  { %265 = shalt.err (!%p262_p8)
}
  0x59   :  { %s266_s1 = scalar_lea.hbm %s396_s2, 32 }
  0x5a   :  { %p267_p9 = scmp.ne.s32.totalorder %s396_s2, %s266_s1  ;;  %p270_p10 = scmp.lt.u32.totalorder %s266_s1, %s396_s2 }
  0x5c   :  { %p272_p11 = pnand %p270_p10, %p267_p9 }
  0x5e   :  { %275 = shalt.err (!%p272_p11)
}
  0x5f   :  { %124 = dma.vmem_to_hbm [thread:$0]  %s346_s18, 32, %s396_s2, [#allocation4]  }
  0x60   :  { %280 = dma.done.wait [#allocation4], 32  }
  0x61   :  { %281 = vsyncadd [#allocation4], 4294967264 }
  0x62   :  { %282 = dma.done.wait [#allocation9], 64  }
  0x63   :  { %283 = vsyncadd [#allocation9], 4294967232 }
  0x64   :  { %154 = vsyncpa [#allocation3], 1 }
  0x65   :  { %155 = vsyncpa [#allocation6], 1 }
  0x66   :  { %156 = vsyncpa [#allocation4], 1 }
  0x67   :  { %157 = vsyncpa [#allocation9], 1 }

</bundles_post_ra>
